<compile_context>
chip_gen: v6e
topology: v6e:2x2x1
jax: 0.10.0
libtpu: 0.0.40
codegen_flags: <defaults>
</compile_context>

<pallas_src>
import math

import jax
import jax.numpy as jnp
from jax.experimental import pallas as pl
from jax.experimental.pallas import tpu as pltpu

_LANE = 128
_VMEM_SPEC = pl.BlockSpec(memory_space=pltpu.MemorySpace.VMEM)


def _round_up(x, m):
    return (x + m - 1) // m * m


def _nbytes(shape, dtype):
    return math.prod(shape) * jnp.dtype(dtype).itemsize


# ----------------------------------------------------------------------------
# Parameter construction (shapes match the PyTorch module, stored pre-fused)
# ----------------------------------------------------------------------------
def init_params(key, vocab_size, embedding_dim, hidden_dim, num_layers):
    """Deterministic synthetic parameters, pre-transposed, bf16, gate order
    [i, f, o, g] along the 4H axis (so sigmoid covers lanes [0,3H) and tanh
    covers lanes [3H,4H) in the kernel)."""
    v_pad = _round_up(vocab_size, _LANE)
    params = {}

    key, k_emb = jax.random.split(key)
    # nn.Embedding(vocab_size, embedding_dim): N(0, 1)
    params["embedding"] = jax.random.normal(
        k_emb, (vocab_size, embedding_dim), jnp.float32).astype(jnp.bfloat16)

    bound = 1.0 / jnp.sqrt(hidden_dim)
    lstm_layers = []
    for layer in range(num_layers):
        in_dim = embedding_dim if layer == 0 else hidden_dim
        key, k1, k2, k3, k4 = jax.random.split(key, 5)
        w_ih_t = jax.random.uniform(k1, (in_dim, 4 * hidden_dim), jnp.float32,
                                    -bound, bound)
        w_hh_t = jax.random.uniform(k2, (hidden_dim, 4 * hidden_dim),
                                    jnp.float32, -bound, bound)
        b_ih = jax.random.uniform(k3, (4 * hidden_dim,), jnp.float32,
                                  -bound, bound)
        b_hh = jax.random.uniform(k4, (4 * hidden_dim,), jnp.float32,
                                  -bound, bound)
        lstm_layers.append({
            "w_ih_t": w_ih_t.astype(jnp.bfloat16),   # (in_dim, 4H), [i,f,o,g]
            "w_hh_t": w_hh_t.astype(jnp.bfloat16),   # (H, 4H),      [i,f,o,g]
            "b": (b_ih + b_hh).reshape(1, 4 * hidden_dim),          # f32
        })
    params["lstm"] = lstm_layers

    key, k_w, k_b = jax.random.split(key, 3)
    fc_w_t = jax.random.uniform(k_w, (hidden_dim, vocab_size), jnp.float32,
                                -bound, bound)
    fc_b = jax.random.uniform(k_b, (vocab_size,), jnp.float32, -bound, bound)
    # Zero-pad the vocab axis to a multiple of 128 lanes (lane-dense stores).
    params["fc_w_t"] = jnp.zeros((hidden_dim, v_pad), jnp.float32).at[
        :, :vocab_size].set(fc_w_t).astype(jnp.bfloat16)
    params["fc_b"] = jnp.zeros((1, v_pad), jnp.float32).at[
        :, :vocab_size].set(fc_b)
    return params


# ----------------------------------------------------------------------------
# Fused decode kernel + wrapper factory
# ----------------------------------------------------------------------------
def make_lstm_decoder_forward(vocab_size, embedding_dim, hidden_dim, num_layers):
    V, E, H, L = vocab_size, embedding_dim, hidden_dim, num_layers
    v_pad = _round_up(V, _LANE)
    n_state = 2 * L * H

    def kernel(ids_ref, state_in_ref, emb_ref, *rest):
        layer_refs = rest[:3 * L]                 # (w_ih, w_hh, b) per layer
        fc_w_ref, fc_b_ref = rest[3 * L], rest[3 * L + 1]
        logits_ref, state_out_ref = rest[3 * L + 2], rest[3 * L + 3]

        B, T = ids_ref.shape
        ids = ids_ref[...]                         # (B, T) int32

        # Per-layer h/c carried across time in registers/VMEM (f32).
        h_cur = [state_in_ref[:, l * H:(l + 1) * H] for l in range(L)]
        c_cur = [state_in_ref[:, (L + l) * H:(L + l + 1) * H] for l in range(L)]

        vocab_iota = jax.lax.broadcasted_iota(jnp.int32, (B, V), 1)

        for t in range(T):   # static unroll: weights stay VMEM-resident
            # --- Embedding lookup as a one-hot matmul on the (idle) MXU -----
            tok = ids[:, t:t + 1]                                    # (B, 1)
            one_hot = (tok == vocab_iota).astype(jnp.bfloat16)       # (B, V)
            layer_in = jnp.dot(one_hot, emb_ref[...],
                               preferred_element_type=jnp.float32)   # (B, E)
            # Embedding dropout = identity (eval mode).

            # --- Stacked LSTM layers (unrolled; L is small & static) --------
            for l in range(L):
                w_ih = layer_refs[3 * l][...]       # (in_dim, 4H) bf16
                w_hh = layer_refs[3 * l + 1][...]   # (H, 4H) bf16
                b = layer_refs[3 * l + 2][...]      # (1, 4H) f32

                # Two accumulated MXU dots — no per-layer lane concat.
                gates = (jnp.dot(layer_in.astype(jnp.bfloat16), w_ih,
                                 preferred_element_type=jnp.float32)
                         + jnp.dot(h_cur[l].astype(jnp.bfloat16), w_hh,
                                   preferred_element_type=jnp.float32)
                         + b)                                        # (B, 4H)

                # Gate order [i, f, o, g]: sigmoid over 3H lanes, tanh over H.
                sig = jax.nn.sigmoid(gates[:, :3 * H])
                g_g = jnp.tanh(gates[:, 3 * H:])
                i_g = sig[:, 0 * H:1 * H]
                f_g = sig[:, 1 * H:2 * H]
                o_g = sig[:, 2 * H:3 * H]

                c_new = f_g * c_cur[l] + i_g * g_g
                h_new = o_g * jnp.tanh(c_new)
                h_cur[l] = h_new
                c_cur[l] = c_new
                layer_in = h_new    # inter-layer dropout = identity (eval)

            # --- fc_out projection to (padded) vocab logits -----------------
            logits_ref[:, t * v_pad:(t + 1) * v_pad] = (
                jnp.dot(layer_in.astype(jnp.bfloat16), fc_w_ref[...],
                        preferred_element_type=jnp.float32) + fc_b_ref[...]
            ).astype(logits_ref.dtype)

        # --- Final h/c written directly into slab slices (no concat) --------
        for l in range(L):
            state_out_ref[:, l * H:(l + 1) * H] = h_cur[l]
            state_out_ref[:, (L + l) * H:(L + l + 1) * H] = c_cur[l]

    def _vmem_limit(B, T):
        total = _nbytes((B, T), jnp.int32) + _nbytes((B, n_state), jnp.float32)
        total += _nbytes((V, E), jnp.bfloat16)
        for layer in range(L):
            in_dim = E if layer == 0 else H
            total += _nbytes((in_dim, 4 * H), jnp.bfloat16)
            total += _nbytes((H, 4 * H), jnp.bfloat16)
            total += _nbytes((1, 4 * H), jnp.float32)
        total += _nbytes((H, v_pad), jnp.bfloat16) + _nbytes((1, v_pad), jnp.float32)
        total += _nbytes((B, T * v_pad), jnp.float32)
        total += _nbytes((B, n_state), jnp.float32)
        # Activation temporaries: one-hot, gates, sig/tanh, etc.
        total += _nbytes((B, V), jnp.float32) + 6 * _nbytes((B, 4 * H), jnp.float32)
        return max(16 << 20, min(2 * int(total) + (4 << 20), 96 << 20))

    @jax.jit
    def forward_slab(params, ids, state):
        """Slab-resident decode step(s).

        Args:
          ids:   (B, T) int32 token ids.
          state: (B, 2*L*H) f32 slab [h_0 .. h_{L-1} | c_0 .. c_{L-1}].
        Returns:
          logits_pad: (B, T, v_pad) f32 (vocab zero-padded to 128 lanes)
          new_state:  (B, 2*L*H) f32 slab.
        """
        B, T = ids.shape
        inputs = [ids.astype(jnp.int32), state, params["embedding"]]
        for layer in range(L):
            p = params["lstm"][layer]
            inputs += [p["w_ih_t"], p["w_hh_t"], p["b"]]
        inputs += [params["fc_w_t"], params["fc_b"]]

        logits_slab, new_state = pl.pallas_call(
            kernel,
            out_shape=(
                jax.ShapeDtypeStruct((B, T * v_pad), jnp.float32),   # logits
                jax.ShapeDtypeStruct((B, n_state), jnp.float32),     # h|c slab
            ),
            in_specs=[_VMEM_SPEC] * len(inputs),
            out_specs=(_VMEM_SPEC, _VMEM_SPEC),
            compiler_params=pltpu.CompilerParams(
                vmem_limit_bytes=_vmem_limit(B, T)),
        )(*inputs)
        return logits_slab.reshape(B, T, v_pad), new_state

    @jax.jit
    def forward(params, x, hidden, cell):
        """PyTorch-convention wrapper.

        Args:
          x:      (B, 1) (or (B, T)) int token ids
          hidden: (L, B, H) float32
          cell:   (L, B, H) float32
        Returns:
          prediction: (B, T, V), hidden: (L, B, H), cell: (L, B, H)
        """
        B = x.shape[0]
        ids = x.reshape(B, -1).astype(jnp.int32)
        state = jnp.concatenate(
            [hidden.transpose(1, 0, 2).reshape(B, L * H),
             cell.transpose(1, 0, 2).reshape(B, L * H)], axis=-1)

        logits_pad, new_state = forward_slab(params, ids, state)

        prediction = logits_pad[:, :, :V]
        hidden_out = new_state[:, :L * H].reshape(B, L, H).transpose(1, 0, 2)
        cell_out = new_state[:, L * H:].reshape(B, L, H).transpose(1, 0, 2)
        return prediction, hidden_out, cell_out

    return forward, forward_slab


# ----------------------------------------------------------------------------
# Pure-JAX reference (mimics the kernel's bf16 weight / cast behavior)
# ----------------------------------------------------------------------------
def reference_forward(params, x, hidden, cell, vocab_size, hidden_dim,
                      num_layers):
    H, L, V = hidden_dim, num_layers, vocab_size
    f32, bf16 = jnp.float32, jnp.bfloat16

    def mm(a, w_bf16):
        return jnp.dot(a.astype(bf16).astype(f32), w_bf16.astype(f32))

    B, T = x.shape
    h = [hidden[l] for l in range(L)]
    c = [cell[l] for l in range(L)]
    emb_f32 = params["embedding"].astype(f32)
    preds = []
    for t in range(T):
        layer_in = jnp.take(emb_f32, x[:, t], axis=0)
        for l in range(L):
            p = params["lstm"][l]
            gates = mm(layer_in, p["w_ih_t"]) + mm(h[l], p["w_hh_t"]) + p["b"]
            i = jax.nn.sigmoid(gates[:, 0 * H:1 * H])
            f = jax.nn.sigmoid(gates[:, 1 * H:2 * H])
            o = jax.nn.sigmoid(gates[:, 2 * H:3 * H])
            g = jnp.tanh(gates[:, 3 * H:4 * H])
            c[l] = f * c[l] + i * g
            h[l] = o * jnp.tanh(c[l])
            layer_in = h[l]
        logits = mm(layer_in, params["fc_w_t"])[:, :V] + params["fc_b"][:, :V]
        preds.append(logits)
    return jnp.stack(preds, axis=1), jnp.stack(h, 0), jnp.stack(c, 0)


# ----------------------------------------------------------------------------
# Main
# ----------------------------------------------------------------------------
if __name__ == "__main__":
    vocab_size = 64
    embedding_dim = 32
    hidden_dim = 32
    num_layers = 2
    batch = 8

    key = jax.random.PRNGKey(0)
    key, k_params, k_x, k_h, k_c = jax.random.split(key, 5)

    params = init_params(k_params, vocab_size, embedding_dim, hidden_dim,
                         num_layers)
    forward, _ = make_lstm_decoder_forward(vocab_size, embedding_dim,
                                           hidden_dim, num_layers)

    x = jax.random.randint(k_x, (batch, 1), 0, vocab_size, dtype=jnp.int32)
    hidden = jax.random.normal(k_h, (num_layers, batch, hidden_dim), jnp.float32)
    cell = jax.random.normal(k_c, (num_layers, batch, hidden_dim), jnp.float32)

    prediction, hidden_out, cell_out = forward(params, x, hidden, cell)
    jax.block_until_ready((prediction, hidden_out, cell_out))

    assert prediction.shape == (batch, 1, vocab_size)
    assert hidden_out.shape == (num_layers, batch, hidden_dim)
    assert cell_out.shape == (num_layers, batch, hidden_dim)

    # Sanity check against a plain-JAX reference (same bf16 weight semantics).
    ref_pred, ref_h, ref_c = reference_forward(
        params, x, hidden, cell, vocab_size, hidden_dim, num_layers)
    assert bool(jnp.allclose(prediction, ref_pred, atol=2e-3, rtol=2e-3))
    assert bool(jnp.allclose(hidden_out, ref_h, atol=2e-3, rtol=2e-3))
    assert bool(jnp.allclose(cell_out, ref_c, atol=2e-3, rtol=2e-3))

    print("KERNEL_OK")
</pallas_src>

<mosaic_0001>
module attributes {stable_mosaic.version = 11 : i64} {
  func.func @kernel(%arg0: memref<8x1xi32, #tpu.memory_space<vmem>>, %arg1: memref<8x128xf32, #tpu.memory_space<vmem>>, %arg2: memref<64x32xbf16, #tpu.memory_space<vmem>>, %arg3: memref<32x128xbf16, #tpu.memory_space<vmem>>, %arg4: memref<32x128xbf16, #tpu.memory_space<vmem>>, %arg5: memref<1x128xf32, #tpu.memory_space<vmem>>, %arg6: memref<32x128xbf16, #tpu.memory_space<vmem>>, %arg7: memref<32x128xbf16, #tpu.memory_space<vmem>>, %arg8: memref<1x128xf32, #tpu.memory_space<vmem>>, %arg9: memref<32x128xbf16, #tpu.memory_space<vmem>>, %arg10: memref<1x128xf32, #tpu.memory_space<vmem>>, %arg11: memref<8x128xf32, #tpu.memory_space<vmem>>, %arg12: memref<8x128xf32, #tpu.memory_space<vmem>>) attributes {dimension_semantics = [], scalar_prefetch = 0 : i64, scratch_operands = 0 : i64, tpu.core_type = #tpu.core_type<tc>} {
    %c0 = arith.constant 0 : index
    %c0_0 = arith.constant 0 : index
    %0 = vector.load %arg0[%c0, %c0_0] : memref<8x1xi32, #tpu.memory_space<vmem>>, vector<8x1xi32>
    %c0_1 = arith.constant 0 : index
    %c0_2 = arith.constant 0 : index
    %1 = vector.load %arg1[%c0_1, %c0_2] : memref<8x128xf32, #tpu.memory_space<vmem>>, vector<8x32xf32>
    %c0_3 = arith.constant 0 : index
    %c32 = arith.constant 32 : index
    %2 = vector.load %arg1[%c0_3, %c32] : memref<8x128xf32, #tpu.memory_space<vmem>>, vector<8x32xf32>
    %c0_4 = arith.constant 0 : index
    %c64 = arith.constant 64 : index
    %3 = vector.load %arg1[%c0_4, %c64] : memref<8x128xf32, #tpu.memory_space<vmem>>, vector<8x32xf32>
    %c0_5 = arith.constant 0 : index
    %c96 = arith.constant 96 : index
    %4 = vector.load %arg1[%c0_5, %c96] : memref<8x128xf32, #tpu.memory_space<vmem>>, vector<8x32xf32>
    %5 = tpu.iota {dimensions = array<i32: 1>} : vector<8x64xi32>
    %6 = vector.broadcast %0 : vector<8x1xi32> to vector<8x64xi32>
    %7 = arith.cmpi eq, %6, %5 : vector<8x64xi32>
    %8 = arith.extui %7 : vector<8x64xi1> to vector<8x64xi32>
    %9 = arith.sitofp %8 : vector<8x64xi32> to vector<8x64xf32>
    %10 = arith.truncf %9 : vector<8x64xf32> to vector<8x64xbf16>
    %c0_6 = arith.constant 0 : index
    %c0_7 = arith.constant 0 : index
    %11 = vector.load %arg2[%c0_6, %c0_7] : memref<64x32xbf16, #tpu.memory_space<vmem>>, vector<64x32xbf16>
    %cst = arith.constant dense<0.000000e+00> : vector<8x32xf32>
    %12 = tpu.matmul %10, %11, %cst {dimension_numbers = #tpu.dot_dimension_numbers<[1], [0], [0], [1], [0, 0, 1, 1], [], []>} : vector<8x64xbf16>, vector<64x32xbf16>, vector<8x32xf32> -> vector<8x32xf32>
    %c0_8 = arith.constant 0 : index
    %c0_9 = arith.constant 0 : index
    %13 = vector.load %arg3[%c0_8, %c0_9] : memref<32x128xbf16, #tpu.memory_space<vmem>>, vector<32x128xbf16>
    %c0_10 = arith.constant 0 : index
    %c0_11 = arith.constant 0 : index
    %14 = vector.load %arg4[%c0_10, %c0_11] : memref<32x128xbf16, #tpu.memory_space<vmem>>, vector<32x128xbf16>
    %c0_12 = arith.constant 0 : index
    %c0_13 = arith.constant 0 : index
    %15 = vector.load %arg5[%c0_12, %c0_13] : memref<1x128xf32, #tpu.memory_space<vmem>>, vector<1x128xf32>
    %16 = arith.truncf %12 : vector<8x32xf32> to vector<8x32xbf16>
    %cst_14 = arith.constant dense<0.000000e+00> : vector<8x128xf32>
    %17 = tpu.matmul %16, %13, %cst_14 {dimension_numbers = #tpu.dot_dimension_numbers<[1], [0], [0], [1], [0, 0, 1, 1], [], []>} : vector<8x32xbf16>, vector<32x128xbf16>, vector<8x128xf32> -> vector<8x128xf32>
    %18 = arith.truncf %1 : vector<8x32xf32> to vector<8x32xbf16>
    %cst_15 = arith.constant dense<0.000000e+00> : vector<8x128xf32>
    %19 = tpu.matmul %18, %14, %cst_15 {dimension_numbers = #tpu.dot_dimension_numbers<[1], [0], [0], [1], [0, 0, 1, 1], [], []>} : vector<8x32xbf16>, vector<32x128xbf16>, vector<8x128xf32> -> vector<8x128xf32>
    %20 = arith.addf %17, %19 : vector<8x128xf32>
    %21 = vector.broadcast %15 : vector<1x128xf32> to vector<8x128xf32>
    %22 = arith.addf %20, %21 : vector<8x128xf32>
    %23 = vector.extract_strided_slice %22 {offsets = [0, 0], sizes = [8, 96], strides = [1, 1]} : vector<8x128xf32> to vector<8x96xf32>
    %24 = arith.negf %23 : vector<8x96xf32>
    %25 = math.exp %24 : vector<8x96xf32>
    %cst_16 = arith.constant 1.000000e+00 : f32
    %26 = vector.broadcast %cst_16 : f32 to vector<8x96xf32>
    %27 = arith.addf %26, %25 : vector<8x96xf32>
    %28 = arith.divf %26, %27 : vector<8x96xf32>
    %29 = vector.extract_strided_slice %22 {offsets = [0, 96], sizes = [8, 32], strides = [1, 1]} : vector<8x128xf32> to vector<8x32xf32>
    %30 = math.tanh %29 : vector<8x32xf32>
    %31 = vector.extract_strided_slice %28 {offsets = [0, 0], sizes = [8, 32], strides = [1, 1]} : vector<8x96xf32> to vector<8x32xf32>
    %32 = vector.extract_strided_slice %28 {offsets = [0, 32], sizes = [8, 32], strides = [1, 1]} : vector<8x96xf32> to vector<8x32xf32>
    %33 = vector.extract_strided_slice %28 {offsets = [0, 64], sizes = [8, 32], strides = [1, 1]} : vector<8x96xf32> to vector<8x32xf32>
    %34 = arith.mulf %32, %3 : vector<8x32xf32>
    %35 = arith.mulf %31, %30 : vector<8x32xf32>
    %36 = arith.addf %34, %35 : vector<8x32xf32>
    %37 = math.tanh %36 : vector<8x32xf32>
    %38 = arith.mulf %33, %37 : vector<8x32xf32>
    %c0_17 = arith.constant 0 : index
    %c0_18 = arith.constant 0 : index
    %39 = vector.load %arg6[%c0_17, %c0_18] : memref<32x128xbf16, #tpu.memory_space<vmem>>, vector<32x128xbf16>
    %c0_19 = arith.constant 0 : index
    %c0_20 = arith.constant 0 : index
    %40 = vector.load %arg7[%c0_19, %c0_20] : memref<32x128xbf16, #tpu.memory_space<vmem>>, vector<32x128xbf16>
    %c0_21 = arith.constant 0 : index
    %c0_22 = arith.constant 0 : index
    %41 = vector.load %arg8[%c0_21, %c0_22] : memref<1x128xf32, #tpu.memory_space<vmem>>, vector<1x128xf32>
    %42 = arith.truncf %38 : vector<8x32xf32> to vector<8x32xbf16>
    %cst_23 = arith.constant dense<0.000000e+00> : vector<8x128xf32>
    %43 = tpu.matmul %42, %39, %cst_23 {dimension_numbers = #tpu.dot_dimension_numbers<[1], [0], [0], [1], [0, 0, 1, 1], [], []>} : vector<8x32xbf16>, vector<32x128xbf16>, vector<8x128xf32> -> vector<8x128xf32>
    %44 = arith.truncf %2 : vector<8x32xf32> to vector<8x32xbf16>
    %cst_24 = arith.constant dense<0.000000e+00> : vector<8x128xf32>
    %45 = tpu.matmul %44, %40, %cst_24 {dimension_numbers = #tpu.dot_dimension_numbers<[1], [0], [0], [1], [0, 0, 1, 1], [], []>} : vector<8x32xbf16>, vector<32x128xbf16>, vector<8x128xf32> -> vector<8x128xf32>
    %46 = arith.addf %43, %45 : vector<8x128xf32>
    %47 = vector.broadcast %41 : vector<1x128xf32> to vector<8x128xf32>
    %48 = arith.addf %46, %47 : vector<8x128xf32>
    %49 = vector.extract_strided_slice %48 {offsets = [0, 0], sizes = [8, 96], strides = [1, 1]} : vector<8x128xf32> to vector<8x96xf32>
    %50 = arith.negf %49 : vector<8x96xf32>
    %51 = math.exp %50 : vector<8x96xf32>
    %cst_25 = arith.constant 1.000000e+00 : f32
    %52 = vector.broadcast %cst_25 : f32 to vector<8x96xf32>
    %53 = arith.addf %52, %51 : vector<8x96xf32>
    %54 = arith.divf %52, %53 : vector<8x96xf32>
    %55 = vector.extract_strided_slice %48 {offsets = [0, 96], sizes = [8, 32], strides = [1, 1]} : vector<8x128xf32> to vector<8x32xf32>
    %56 = math.tanh %55 : vector<8x32xf32>
    %57 = vector.extract_strided_slice %54 {offsets = [0, 0], sizes = [8, 32], strides = [1, 1]} : vector<8x96xf32> to vector<8x32xf32>
    %58 = vector.extract_strided_slice %54 {offsets = [0, 32], sizes = [8, 32], strides = [1, 1]} : vector<8x96xf32> to vector<8x32xf32>
    %59 = vector.extract_strided_slice %54 {offsets = [0, 64], sizes = [8, 32], strides = [1, 1]} : vector<8x96xf32> to vector<8x32xf32>
    %60 = arith.mulf %58, %4 : vector<8x32xf32>
    %61 = arith.mulf %57, %56 : vector<8x32xf32>
    %62 = arith.addf %60, %61 : vector<8x32xf32>
    %63 = math.tanh %62 : vector<8x32xf32>
    %64 = arith.mulf %59, %63 : vector<8x32xf32>
    %65 = arith.truncf %64 : vector<8x32xf32> to vector<8x32xbf16>
    %c0_26 = arith.constant 0 : index
    %c0_27 = arith.constant 0 : index
    %66 = vector.load %arg9[%c0_26, %c0_27] : memref<32x128xbf16, #tpu.memory_space<vmem>>, vector<32x128xbf16>
    %cst_28 = arith.constant dense<0.000000e+00> : vector<8x128xf32>
    %67 = tpu.matmul %65, %66, %cst_28 {dimension_numbers = #tpu.dot_dimension_numbers<[1], [0], [0], [1], [0, 0, 1, 1], [], []>} : vector<8x32xbf16>, vector<32x128xbf16>, vector<8x128xf32> -> vector<8x128xf32>
    %c0_29 = arith.constant 0 : index
    %c0_30 = arith.constant 0 : index
    %68 = vector.load %arg10[%c0_29, %c0_30] : memref<1x128xf32, #tpu.memory_space<vmem>>, vector<1x128xf32>
    %69 = vector.broadcast %68 : vector<1x128xf32> to vector<8x128xf32>
    %70 = arith.addf %67, %69 : vector<8x128xf32>
    %c0_31 = arith.constant 0 : index
    %c0_32 = arith.constant 0 : index
    %71 = vector.load %arg11[%c0_31, %c0_32] : memref<8x128xf32, #tpu.memory_space<vmem>>, vector<8x128xf32>
    tpu.vector_store %arg11[%c0_31, %c0_32], %70 {strides = array<i32>} : memref<8x128xf32, #tpu.memory_space<vmem>>, vector<8x128xf32>,
    %c0_33 = arith.constant 0 : index
    %c0_34 = arith.constant 0 : index
    %72 = vector.load %arg12[%c0_33, %c0_34] : memref<8x128xf32, #tpu.memory_space<vmem>>, vector<8x32xf32>
    tpu.vector_store %arg12[%c0_33, %c0_34], %38 {strides = array<i32>} : memref<8x128xf32, #tpu.memory_space<vmem>>, vector<8x32xf32>,
    %c0_35 = arith.constant 0 : index
    %c64_36 = arith.constant 64 : index
    %73 = vector.load %arg12[%c0_35, %c64_36] : memref<8x128xf32, #tpu.memory_space<vmem>>, vector<8x32xf32>
    tpu.vector_store %arg12[%c0_35, %c64_36], %36 {strides = array<i32>} : memref<8x128xf32, #tpu.memory_space<vmem>>, vector<8x32xf32>,
    %c0_37 = arith.constant 0 : index
    %c32_38 = arith.constant 32 : index
    %74 = vector.load %arg12[%c0_37, %c32_38] : memref<8x128xf32, #tpu.memory_space<vmem>>, vector<8x32xf32>
    tpu.vector_store %arg12[%c0_37, %c32_38], %64 {strides = array<i32>} : memref<8x128xf32, #tpu.memory_space<vmem>>, vector<8x32xf32>,
    %c0_39 = arith.constant 0 : index
    %c96_40 = arith.constant 96 : index
    %75 = vector.load %arg12[%c0_39, %c96_40] : memref<8x128xf32, #tpu.memory_space<vmem>>, vector<8x32xf32>
    tpu.vector_store %arg12[%c0_39, %c96_40], %62 {strides = array<i32>} : memref<8x128xf32, #tpu.memory_space<vmem>>, vector<8x32xf32>,
    return
  }
}

</mosaic_0001>

<bundles_post_ra>
// kernel: forward_slab.1
= control target key start
LH: loop header
LB: loop body
LE: loop exit
PB: predicated region body
PF: predicated region fallthrough
CT: control target
= control target key end

     0   :  { %18 = vsyncpa [#allocation3], 0  ;;  %s1054_s0 = inlined_call_operand.vmem [shape: s32[8,1], index: 0, kind: input, shape index: {}]   ;;  %s1055_s1 = inlined_call_operand.vmem [shape: f32[8,128], index: 1, kind: input, shape index: {}]   ;;  %s1056_s2 = inlined_call_operand.vmem [shape: bf16[64,32], index: 2, kind: input, shape index: {}]   ;;  %s1057_s3 = inlined_call_operand.vmem [shape: bf16[32,128], index: 3, kind: input, shape index: {}]   ;;  %s1058_s4 = inlined_call_operand.vmem [shape: bf16[32,128], index: 4, kind: input, shape index: {}]   ;;  %s1059_s5 = inlined_call_operand.hbm [shape: f32[1,128], index: 5, kind: input, shape index: {}]   ;;  %s1060_s6 = inlined_call_operand.vmem [shape: bf16[32,128], index: 6, kind: input, shape index: {}]   ;;  %s1061_s7 = inlined_call_operand.vmem [shape: bf16[32,128], index: 7, kind: input, shape index: {}]   ;;  %s1062_s8 = inlined_call_operand.vmem [shape: f32[1,128], index: 8, kind: input, shape index: {}]   ;;  %s1063_s9 = inlined_call_operand.hbm [shape: bf16[32,128], index: 9, kind: input, shape index: {}]   ;;  %s1064_s10 = inlined_call_operand.hbm [shape: f32[1,128], index: 10, kind: input, shape index: {}]   ;;  %s1065_s11 = inlined_call_operand.hbm [shape: f32[8,128], index: 11, kind: output, shape index: {0}]   ;;  %s1066_s12 = inlined_call_operand.hbm [shape: f32[8,128], index: 12, kind: output, shape index: {1}]  }
   0x1   :  { %19 = vsyncpa [#allocation6], 0 }
   0x2   :  { %20 = vsyncpa [#allocation4], 0 }
   0x3   :  { %21 = vsyncpa [#allocation10], 0  ;;  %s857_s21 = smov [#allocation5]  }
   0x4   :  { %s53_s22 = sshll.u32 %s857_s21, 4  ;;  %s54_s22 = int_to_ptr.vmem [resolvable:$true] %s53_s22 }
   0x5   :  { %s757_s23 = scalar_lea.vmem %s54_s22, 256  ;;  %p762_p1 = scmp.lt.s32.totalorder %s54_s22, %s54_s22 }
   0x6   :  { %p758_p0 = scmp.ne.s32.totalorder %s54_s22, %s757_s23  ;;  %p763_p2 = scmp.lt.s32.totalorder %s757_s23, %s757_s23 }
   0x8   :  { %p764_p3 = por %p763_p2, %p762_p1 }
   0xa   :  { %p765_p4 = pnand %p764_p3, %p758_p0 }
   0xc   :  { %768 = shalt.err (!%p765_p4)
}
   0xd   :  { %s858_s24 = smov 64   ;;  %s859_s25 = smov 4  }
   0xe   :  { %59 = dma.hbm_to_vmem [thread:$0]  %s1063_s9, 256, %s54_s22, [#allocation6], %s858_s24, %s858_s24, %s859_s25  }
   0xf   :  { %s860_s28 = smov [#allocation2]   ;;  %s861_s30 = smov [#allocation7]  }
  0x10   :  { %s38_s29 = sshll.u32 %s860_s28, 4  ;;  %s66_s13 = sshll.u32 %s861_s30, 4  ;;  %s39_s29 = int_to_ptr.vmem [resolvable:$true] %s38_s29  ;;  %s67_s13 = int_to_ptr.vmem [resolvable:$true] %s66_s13 }
  0x11   :  { %s777_s14 = scalar_lea.vmem %s39_s29, 16  ;;  %s781_s15 = scalar_lea.vmem %s39_s29, 32 }
  0x12   :  { %p778_p5 = scmp.ne.s32.totalorder %s39_s29, %s777_s14  ;;  %p782_p6 = scmp.lt.s32.totalorder %s39_s29, %s39_s29 }
  0x13   :  { %p783_p7 = scmp.lt.s32.totalorder %s781_s15, %s777_s14 }
  0x15   :  { %p784_p8 = por %p783_p7, %p782_p6 }
  0x17   :  { %p785_p9 = pnand %p784_p8, %p778_p5 }
  0x19   :  { %788 = shalt.err (!%p785_p9)
}
  0x1a   :  { %41 = dma.hbm_to_vmem [thread:$0]  %s1059_s5, 16, %s39_s29, [#allocation3]  }
  0x1b   :  { %s797_s18 = scalar_lea.vmem %s67_s13, 16  ;;  %s801_s9 = scalar_lea.vmem %s67_s13, 32 }
  0x1c   :  { %p798_p10 = scmp.ne.s32.totalorder %s67_s13, %s797_s18  ;;  %p802_p11 = scmp.lt.s32.totalorder %s67_s13, %s67_s13 }
  0x1d   :  { %p803_p12 = scmp.lt.s32.totalorder %s801_s9, %s797_s18 }
  0x1f   :  { %p804_p13 = por %p803_p12, %p802_p11 }
  0x21   :  { %p805_p0 = pnand %p804_p13, %p798_p10 }
  0x23   :  { %808 = shalt.err (!%p805_p0)
}
  0x24   :  { %69 = dma.hbm_to_vmem [thread:$0]  %s1064_s10, 16, %s67_s13, [#allocation6]  }
  0x25   :  { %849 = dma.done.wait [#allocation3], 16  }
  0x26   :  { %850 = vsyncadd [#allocation3], 4294967280 }
  0x27   :  { %851 = dma.done.wait [#allocation6], 272  }
  0x28   :  { %852 = vsyncadd [#allocation6], 4294967024  ;;  %v862_v0 = vmov 0   ;;  %v863_v1 = vmov 0.0   ;;  %v80_v2 = vld [vmem:[%s1054_s0] sm:$0xff]  ;;  %vm864_vm0 = vmmov 0   ;;  %v82_v13 = vlaneseq }
  0x29   :  { %718 = vset.pattern.permute.xlu0 %v862_v0  ;;  %654 = vmatprep.subr.bf16.mxu0 %v863_v1  ;;  %v719_v3 = vld [vmem:[%s1056_s2 + $0x18] sm:$0xff]   ;;  %v720_v4 = vld [vmem:[%s1056_s2 + $0x10] sm:$0xff]   ;;  %v723_v5 = vld [vmem:[%s1058_s4 + $0x8] sm:$0xff]   ;;  %vm190_vm1 = vcmask 261120   ;;  %vm123_vm3 = vcmask 523264   ;;  %vm564_vm4 = vcmask 785920  }
  0x2a   :  { %666 = vmatprep.subr.bf16.mxu1 %v863_v1  ;;  %662 = vmatprep.mubr.msk.bf16.mxu0 %vm864_vm0, %v863_v1  ;;  %v721_v6 = vld [vmem:[%s1056_s2 + $0x8] sm:$0xff]   ;;  %v724_v7 = vld [vmem:[%s1058_s4] sm:$0xff]   ;;  %v83_v14 = vand.u32 127, %v82_v13  ;;  %vm570_vm5 = vcmask 523520   ;;  %vm576_vm6 = vcmask 1048320  }
  0x2b   :  { %670 = vmatprep.mubr.msk.bf16.mxu1 %vm864_vm0, %v863_v1  ;;  %85 = vperm.xlu0 %718, %v80_v2   ;;  %v973_v8 = vld [vmem:[%s1055_s1] sm:$0xff]  ;;  %v725_v10 = vld [vmem:[%s1057_s3 + $0x8] sm:$0xff]  }
  0x2c   :  { %655 = vmatpush3.bf16.msra.mxu0 %v719_v3  ;;  %667 = vmatpush3.bf16.msra.mxu1 %v723_v5  ;;  %v722_v9 = vld [vmem:[%s1056_s2] sm:$0xff]   ;;  %v177_v11 = vpack.c.bf16 %v973_v8, %v973_v8  ;;  %s865_s2 = smov 96   ;;  %v727_v45 = vld [vmem:[%s1061_s7 + $0x8] sm:$0xff]  }
  0x2d   :  { %656 = vmatprep.subr.bf16.mxu0 %v863_v1  ;;  %668 = vmatprep.subr.bf16.mxu1 %v863_v1  ;;  %v726_v12 = vld [vmem:[%s1057_s3] sm:$0xff]   ;;  %s866_s3 = smov 32   ;;  %v729_v46 = vld [vmem:[%s1060_s6 + $0x8] sm:$0xff]  }
  0x2e   :  { %304 = vrot.lane.b32.xlu1 %v973_v8, %s865_s2  ;;  %v620_v27 = vld [vmem:[#allocation2] ss:$0 sm:$0xff] }
  0x2f   :  { %v728_v47 = vld [vmem:[%s1061_s7] sm:$0xff]  }
  0x30   :  { %657 = vmatpush3.bf16.msra.mxu0 %v720_v4  ;;  %669 = vmatpush3.bf16.msra.mxu1 %v724_v7  ;;  %v730_v48 = vld [vmem:[%s1060_s6] sm:$0xff]  }
  0x31   :  { %658 = vmatprep.subr.bf16.mxu0 %v863_v1  ;;  %674 = vmatprep.subr.bf16.mxu1 %v863_v1  ;;  %v628_v59 = vld [vmem:[%s1062_s8] ss:$0 sm:$0xff]  ;;  %s867_s8 = smov [#allocation9]  }
  0x32   :  { %s594_s25 = sshll.u32 %s867_s8, 4  ;;  %s595_s25 = int_to_ptr.vmem [resolvable:$true] %s594_s25 }
  0x33   :  { %671 = vmatmul.mubr.msk.bf16.vlgmr.msra.gmra.mxu1 %vm190_vm1, %v177_v11  ;;  %s809_s0 = scalar_lea.vmem %s595_s25, 128  ;;  %p814_p2 = scmp.lt.s32.totalorder %s595_s25, %s595_s25 }
  0x34   :  { %659 = vmatpush3.bf16.msra.mxu0 %v721_v6  ;;  %675 = vmatpush3.bf16.msra.mxu1 %v725_v10  ;;  %p810_p1 = scmp.ne.s32.totalorder %s595_s25, %s809_s0  ;;  %p815_p3 = scmp.lt.s32.totalorder %s809_s0, %s809_s0 }
  0x35   :  { %660 = vmatprep.subr.bf16.mxu0 %v863_v1  ;;  %676 = vmatprep.subr.bf16.mxu1 %v863_v1 }
  0x36   :  { %678 = vmatprep.mubr.msk.bf16.mxu1 %vm864_vm0, %v863_v1  ;;  %p816_p4 = por %p815_p3, %p814_p2 }
  0x38   :  { %661 = vmatpush3.bf16.msra.mxu0 %v722_v9  ;;  %677 = vmatpush3.bf16.msra.mxu1 %v726_v12  ;;  %p817_p5 = pnand %p816_p4, %p810_p1 }
  0x39   :  { %682 = vmatprep.subr.bf16.mxu0 %v863_v1  ;;  %690 = vmatprep.subr.bf16.mxu1 %v863_v1 }
  0xa0   :  { %v305_v41 = vpop.permute.xlu1 %304 }
  0xa6   :  { %v86_v15 = vpop.permute.xlu0 %85 }
  0xa7   :  { %vm87_vm2 = vcmp.eq.s32.totalorder %v86_v15, %v83_v14  ;;  %v731_v15 = vld [vmem:[#allocation5 + $0x8] sm:$0xff]  }
  0xa8   :  { %v608_v16 = vsel %vm87_vm2, 1.0, %v863_v1 }
  0xa9   :  { %v90_v17 = vpack.c.bf16 %v608_v16, %v608_v16  ;;  %v732_v16 = vld [vmem:[#allocation5] sm:$0xff]  }
  0xab   :  { %663 = vmatmul.mubr.msk.bf16.vlgmr.msra.gmra.mxu0 %vm123_vm3, %v90_v17 }
  0xac   :  { %686 = vmatprep.mubr.msk.bf16.mxu0 %vm864_vm0, %v863_v1  ;;  %683 = vmatpush3.bf16.msra.mxu0 %v727_v45 }
  0xad   :  { %684 = vmatprep.subr.bf16.mxu0 %v863_v1 }
  0xb0   :  { %685 = vmatpush3.bf16.msra.mxu0 %v728_v47 }
  0xb1   :  { %698 = vmatprep.subr.bf16.mxu0 %v863_v1 }
  0xf3   :  { %v228_v18 = vpop.f32.mrf.mxu1 }
  0xf5   :  { %v672_v19 = vpop.f32.mrf.mxu1 }
  0xf7   :  { %v231_v20 = vpop.f32.mrf.mxu1 }
  0xf9   :  { %v673_v21 = vpop.f32.mrf.mxu1 }
 0x16b   :  { %v161_v22 = vpop.f32.mrf.mxu0 }
 0x16c   :  { %v176_v23 = vpack.c.bf16 %v161_v22, %v161_v22 }
 0x16d   :  { %v664_v24 = vpop.f32.mrf.mxu0 }
 0x16e   :  { %679 = vmatmul.mubr.msk.bf16.vlgmr.msra.gmra.mxu1 %vm190_vm1, %v176_v23 }
 0x16f   :  { %v164_v25 = vpop.f32.mrf.mxu0  ;;  %694 = vmatprep.mubr.msk.bf16.mxu1 %vm864_vm0, %v863_v1  ;;  %691 = vmatpush3.bf16.msra.mxu1 %v729_v46 }
 0x170   :  { %692 = vmatprep.subr.bf16.mxu1 %v863_v1 }
 0x171   :  { %v665_v26 = vpop.f32.mrf.mxu0 }
 0x173   :  { %693 = vmatpush3.bf16.msra.mxu1 %v730_v48 }
 0x22e   :  { %v283_v28 = vpop.f32.mrf.mxu1 }
 0x22f   :  { %v284_v29 = vadd.f32 %v283_v28, %v228_v18 }
 0x230   :  { %v680_v30 = vpop.f32.mrf.mxu1 }
 0x231   :  { %v295_v31 = vadd.f32 %v620_v27, %v284_v29 }
 0x232   :  { %v286_v32 = vpop.f32.mrf.mxu1 }
 0x233   :  { %733 = vtanh.f32 %v295_v31  ;;  %v621_v35 = vmul.f32 -1.442695, %v295_v31 }
 0x234   :  { %v681_v33 = vpop.f32.mrf.mxu1 }
 0x235   :  { %735 = vpow2.f32 %v621_v35 }
 0x240   :  { %v734_v34 = vpop.eup %733 }
 0x241   :  { %309 = vrot.lane.b32.xlu0 %v734_v34, %s866_s3 }
 0x242   :  { %v736_v36 = vpop.eup %735 }
 0x243   :  { %v299_v37 = vadd.f32 1.0, %v736_v36 }
 0x245   :  { %737 = vrcp.f32 %v299_v37 }
 0x252   :  { %v738_v38 = vpop.eup %737 }
 0x253   :  { %v307_v42 = vmul.f32 %v738_v38, %v305_v41 }
 0x2b3   :  { %v310_v39 = vpop.permute.xlu0 %309 }
 0x2b4   :  { %v312_v40 = vmul.f32 %v738_v38, %v310_v39 }
 0x2b6   :  { %314 = vrot.lane.b32.xlu1 %v312_v40, %s866_s3 }
 0x2ba   :  { %335 = vrot.lane.b32.xlu1 %v177_v11, %s865_s2 }
 0x328   :  { %v315_v43 = vpop.permute.xlu1 %314 }
 0x329   :  { %v1007_v44 = vadd.f32 %v315_v43, %v307_v42 }
 0x32b   :  { %739 = vtanh.f32 %v1007_v44 }
 0x32c   :  { %v336_v49 = vpop.permute.xlu1 %335 }
 0x32d   :  { %687 = vmatmul.mubr.msk.bf16.vlgmr.msra.gmra.mxu0 %vm190_vm1, %v336_v49 }
 0x32e   :  { %702 = vmatprep.mubr.msk.bf16.mxu0 %vm864_vm0, %v863_v1  ;;  %699 = vmatpush3.bf16.msra.mxu0 %v731_v15 }
 0x32f   :  { %700 = vmatprep.subr.bf16.mxu0 %v863_v1 }
 0x332   :  { %701 = vmatpush3.bf16.msra.mxu0 %v732_v16 }
 0x338   :  { %v740_v50 = vpop.eup %739 }
 0x339   :  { %320 = vrot.lane.b32.xlu0 %v740_v50, %s866_s3 }
 0x3ab   :  { %v321_v51 = vpop.permute.xlu0 %320 }
 0x3ac   :  { %v323_v52 = vmul.f32 %v738_v38, %v321_v51 }
 0x3ae   :  { %v333_v53 = vpack.c.bf16 %v323_v52, %v323_v52 }
 0x3b0   :  { %393 = vrot.lane.b32.xlu0 %v333_v53, %s858_s24 }
 0x3b4   :  { %464 = vrot.lane.b32.xlu0 %v973_v8, %s858_s24 }
 0x3ed   :  { %v386_v54 = vpop.f32.mrf.mxu0 }
 0x3ef   :  { %v688_v55 = vpop.f32.mrf.mxu0 }
 0x3f1   :  { %v389_v56 = vpop.f32.mrf.mxu0 }
 0x3f3   :  { %v689_v57 = vpop.f32.mrf.mxu0 }
 0x422   :  { %v394_v58 = vpop.permute.xlu0 %393 }
 0x423   :  { %695 = vmatmul.mubr.msk.bf16.vlgmr.msra.gmra.mxu1 %vm190_vm1, %v394_v58 }
 0x426   :  { %v465_v10 = vpop.permute.xlu0 %464 }
 0x4e3   :  { %v444_v60 = vpop.f32.mrf.mxu1 }
 0x4e4   :  { %v445_v61 = vadd.f32 %v444_v60, %v386_v54 }
 0x4e5   :  { %v696_v62 = vpop.f32.mrf.mxu1 }
 0x4e6   :  { %v456_v63 = vadd.f32 %v628_v59, %v445_v61 }
 0x4e7   :  { %v447_v0 = vpop.f32.mrf.mxu1 }
 0x4e8   :  { %741 = vtanh.f32 %v456_v63  ;;  %v629_v4 = vmul.f32 -1.442695, %v456_v63 }
 0x4e9   :  { %v697_v2 = vpop.f32.mrf.mxu1 }
 0x4ea   :  { %743 = vpow2.f32 %v629_v4 }
 0x4f5   :  { %v742_v3 = vpop.eup %741 }
 0x4f6   :  { %469 = vrot.lane.b32.xlu1 %v742_v3, %s866_s3 }
 0x4f7   :  { %v744_v5 = vpop.eup %743 }
 0x4f8   :  { %v460_v6 = vadd.f32 1.0, %v744_v5 }
 0x4fa   :  { %745 = vrcp.f32 %v460_v6 }
 0x507   :  { %v746_v7 = vpop.eup %745 }
 0x508   :  { %v467_v11 = vmul.f32 %v746_v7, %v465_v10 }
 0x568   :  { %v470_v8 = vpop.permute.xlu1 %469 }
 0x569   :  { %v472_v9 = vmul.f32 %v746_v7, %v470_v8 }
 0x56b   :  { %474 = vrot.lane.b32.xlu1 %v472_v9, %s866_s3 }
 0x5dd   :  { %v475_v12 = vpop.permute.xlu1 %474 }
 0x5de   :  { %v477_v13 = vadd.f32 %v475_v12, %v467_v11 }
 0x5e0   :  { %747 = vtanh.f32 %v477_v13 }
 0x5ed   :  { %v748_v14 = vpop.eup %747 }
 0x5ee   :  { %480 = vrot.lane.b32.xlu0 %v748_v14, %s866_s3 }
 0x5f2   :  { %556 = vrot.lane.b32.xlu0 %v323_v52, %s858_s24 }
 0x660   :  { %v481_v17 = vpop.permute.xlu0 %480 }
 0x661   :  { %v483_v18 = vmul.f32 %v746_v7, %v481_v17 }
 0x663   :  { %567 = vrot.lane.b32.xlu0 %v483_v18, %s865_s2  ;;  %v484_v19 = vpack.c.bf16 %v483_v18, %v483_v18 }
 0x664   :  { %v557_v20 = vpop.permute.xlu0 %556 }
 0x665   :  { %559 = vst.msk [vmem:[#allocation9] sm:$0xff] %vm190_vm1, %v557_v20  ;;  %497 = vrot.lane.b32.xlu1 %v484_v19, %s858_s24 }
 0x669   :  { %561 = vrot.lane.b32.xlu1 %v1007_v44, %s866_s3 }
 0x66d   :  { %573 = vrot.lane.b32.xlu1 %v477_v13, %s858_s24 }
 0x6d5   :  { %v568_v22 = vpop.permute.xlu0 %567 }
 0x6d7   :  { %v498_v21 = vpop.permute.xlu1 %497 }
 0x6d8   :  { %703 = vmatmul.mubr.msk.bf16.vlgmr.msra.gmra.mxu0 %vm190_vm1, %v498_v21 }
 0x6db   :  { %v562_v1 = vpop.permute.xlu1 %561 }
 0x6dc   :  { %565 = vst.msk [vmem:[#allocation9] sm:$0xff] %vm564_vm4, %v562_v1 }
 0x6dd   :  { %571 = vst.msk [vmem:[#allocation9] sm:$0xff] %vm570_vm5, %v568_v22 }
 0x6df   :  { %v574_v23 = vpop.permute.xlu1 %573 }
 0x6e0   :  { %577 = vst.msk [vmem:[#allocation9] sm:$0xff] %vm576_vm6, %v574_v23 }
 0x6e1   :  { %820 = shalt.err (!%p817_p5)
}
 0x6e2   :  { %597 = dma.vmem_to_hbm [thread:$0]  %s595_s25, 128, %s1066_s12, [#allocation10]   ;;  %v630_v24 = vld [vmem:[#allocation7] ss:$0 sm:$0xff] }
 0x6e3   :  { %s868_s27 = smov [#allocation8]  }
 0x6e4   :  { %s584_s28 = sshll.u32 %s868_s27, 4  ;;  %s585_s28 = int_to_ptr.vmem [resolvable:$true] %s584_s28 }
 0x6e5   :  { %s829_s29 = scalar_lea.vmem %s585_s28, 128  ;;  %p834_p7 = scmp.lt.s32.totalorder %s585_s28, %s585_s28 }
 0x6e6   :  { %p830_p6 = scmp.ne.s32.totalorder %s585_s28, %s829_s29  ;;  %p835_p8 = scmp.lt.s32.totalorder %s829_s29, %s829_s29 }
 0x6e8   :  { %p836_p9 = por %p835_p8, %p834_p7 }
 0x6ea   :  { %p837_p10 = pnand %p836_p9, %p830_p6 }
 0x798   :  { %v548_v25 = vpop.f32.mrf.mxu0 }
 0x799   :  { %v549_v26 = vadd.f32 %v630_v24, %v548_v25 }
 0x79a   :  { %v704_v27 = vpop.f32.mrf.mxu0 }
 0x79b   :  { %554 = vst [vmem:[#allocation8] sm:$0xff] %v549_v26 }
 0x79c   :  { %v551_v28 = vpop.f32.mrf.mxu0 }
 0x79d   :  { %840 = shalt.err (!%p837_p10)
}
 0x79e   :  { %587 = dma.vmem_to_hbm [thread:$0]  %s585_s28, 128, %s1065_s11, [#allocation4]   ;;  %v705_v29 = vpop.f32.mrf.mxu0 }
 0x79f   :  { %853 = dma.done.wait [#allocation4], 128  }
 0x7a0   :  { %854 = vsyncadd [#allocation4], 4294967168 }
 0x7a1   :  { %855 = dma.done.wait [#allocation10], 128  }
 0x7a2   :  { %856 = vsyncadd [#allocation10], 4294967168 }
 0x7a3   :  { %604 = vsyncpa [#allocation3], 1 }
 0x7a4   :  { %605 = vsyncpa [#allocation6], 1 }
 0x7a5   :  { %606 = vsyncpa [#allocation4], 1 }
 0x7a6   :  { %607 = vsyncpa [#allocation10], 1 }

</bundles_post_ra>
